<compile_context>
chip_gen: v5e
topology: v5e:2x2
jax: 0.10.0
libtpu: 0.0.40
codegen_flags: <defaults>
</compile_context>

<pallas_src>
import functools

import jax
import jax.numpy as jnp
from jax.experimental import pallas as pl
from jax.experimental.pallas import tpu as pltpu


def _round_up(x, m):
    return (x + m - 1) // m * m


def _critic_kernel(s_ref, a_ref, w1_ref, b1_ref, w2_ref, b2_ref,
                   w3_ref, b3_ref, out_ref):
    # Layer 1: h1 = relu([state, action] @ W1 + b1).
    # The concat is an in-VMEM lane concat; bf16 MXU operands (weights are
    # already bf16 from the wrapper), f32 accumulation.
    sa = jnp.concatenate([s_ref[...], a_ref[...]], axis=-1).astype(jnp.bfloat16)
    h1 = jnp.dot(sa, w1_ref[...], preferred_element_type=jnp.float32)
    h1 = jnp.maximum(h1 + b1_ref[...], 0.0)

    # Layer 2: h2 = relu(h1 @ W2 + b2).
    h2 = jnp.dot(h1.astype(jnp.bfloat16), w2_ref[...],
                 preferred_element_type=jnp.float32)
    h2 = jnp.maximum(h2 + b2_ref[...], 0.0)

    # Layer 3 (single output column): VPU multiply + f32 lane reduction
    # instead of an N=1 (<1% utilized) MXU matmul; b3 is a scalar from SMEM.
    q = jnp.sum(h2 * w3_ref[...], axis=-1, keepdims=True) + b3_ref[0]
    out_ref[...] = q.astype(out_ref.dtype)


@functools.partial(jax.jit, static_argnames=("block_b",))
def mlp_critic_forward(state, action, params, *, block_b=512):
    """q1 = l3(relu(l2(relu(l1(cat([state, action], 1))))))"""
    w1, b1, w2, b2, w3, b3 = params
    B, S = state.shape
    A = action.shape[1]
    H = w1.shape[1]

    # Pre-cast resident weights to bf16 once (full-rate MXU, half the DMA and
    # VMEM); biases + the layer-3 row stay f32 for the f32 epilogue/reduction.
    w1_bf = w1.astype(jnp.bfloat16)          # (S+A, H), kept unsplit
    w2_bf = w2.astype(jnp.bfloat16)          # (H, H)
    w3_row = w3.reshape(1, H)                # (1, H) f32 for the VPU reduction
    b3_s = b3.reshape(1)                     # scalar bias -> SMEM

    # Batch tiling: TM multiple of 16; aim for >= 2 grid steps when the batch
    # allows (both v7x TensorCores busy, pipelining active), capped by block_b.
    TM = min(_round_up(block_b, 16),
             _round_up(B, 16),
             max(16, _round_up(pl.cdiv(B, 2), 16)))
    B_pad = _round_up(B, TM)
    if B_pad != B:
        pad = ((0, B_pad - B), (0, 0))
        state = jnp.pad(state, pad)
        action = jnp.pad(action, pad)
    # NOTE: padded rows produce garbage q values (bias+ReLU of zeros); they
    # are sliced off below and never read.

    const = lambda i: (0, 0)
    cost = pl.CostEstimate(
        flops=2 * B_pad * H * (S + A + H + 1),
        transcendentals=0,
        bytes_accessed=(4 * B_pad * (S + A)            # f32 activations in
                        + 2 * ((S + A) * H + H * H)    # bf16 weights
                        + 4 * (3 * H + 1)              # f32 biases + W3 row
                        + 4 * B_pad),                  # f32 q out (1 lane)
    )

    out = pl.pallas_call(
        _critic_kernel,
        out_shape=jax.ShapeDtypeStruct((B_pad, 1), jnp.float32),
        grid=(B_pad // TM,),
        in_specs=[
            pl.BlockSpec((TM, S), lambda i: (i, 0)),     # state tile
            pl.BlockSpec((TM, A), lambda i: (i, 0)),     # action tile
            pl.BlockSpec((S + A, H), const),             # W1 bf16 (resident)
            pl.BlockSpec((1, H), const),                 # b1
            pl.BlockSpec((H, H), const),                 # W2 bf16 (resident)
            pl.BlockSpec((1, H), const),                 # b2
            pl.BlockSpec((1, H), const),                 # W3 row (f32)
            pl.BlockSpec(memory_space=pltpu.MemorySpace.SMEM),  # b3 scalar
        ],
        out_specs=pl.BlockSpec((TM, 1), lambda i: (i, 0)),
        compiler_params=pltpu.CompilerParams(
            dimension_semantics=("parallel",),
            vmem_limit_bytes=32 * 1024 * 1024,
        ),
        cost_estimate=cost,
    )(state, action, w1_bf, b1, w2_bf, b2, w3_row, b3_s)

    return out[:B]


def init_params(key, state_dim, action_dim, hidden_dim=256):
    """torch.nn.Linear-style init; W stored [in, out], b stored [1, out]."""
    def linear(key, fan_in, fan_out):
        kw, kb = jax.random.split(key)
        bound = 1.0 / jnp.sqrt(jnp.float32(fan_in))
        w = jax.random.uniform(kw, (fan_in, fan_out), jnp.float32,
                               minval=-bound, maxval=bound)
        b = jax.random.uniform(kb, (1, fan_out), jnp.float32,
                               minval=-bound, maxval=bound)
        return w, b

    k1, k2, k3 = jax.random.split(key, 3)
    w1, b1 = linear(k1, state_dim + action_dim, hidden_dim)
    w2, b2 = linear(k2, hidden_dim, hidden_dim)
    w3, b3 = linear(k3, hidden_dim, 1)
    return (w1, b1, w2, b2, w3, b3)


def reference_forward(state, action, params):
    """Plain-JAX f32 reference matching the PyTorch forward."""
    w1, b1, w2, b2, w3, b3 = params
    sa = jnp.concatenate([state, action], axis=1)
    q = jnp.maximum(sa @ w1 + b1, 0.0)
    q = jnp.maximum(q @ w2 + b2, 0.0)
    return q @ w3 + b3


if __name__ == "__main__":
    # Small, deterministic shapes consistent with the module.
    batch, state_dim, action_dim, hidden_dim = 8, 24, 8, 32

    key = jax.random.PRNGKey(0)
    k_state, k_action, k_params = jax.random.split(key, 3)

    state = jax.random.normal(k_state, (batch, state_dim), jnp.float32)
    action = jax.random.normal(k_action, (batch, action_dim), jnp.float32)
    params = init_params(k_params, state_dim, action_dim, hidden_dim)

    q1 = jax.block_until_ready(mlp_critic_forward(state, action, params))
    ref = jax.block_until_ready(reference_forward(state, action, params))
    assert q1.shape == (batch, 1)
    # bf16 MXU operands / f32 accumulation: deliberate precision trade-off for
    # an RL critic -> relaxed tolerance vs. the pure-f32 reference.
    assert jnp.allclose(q1, ref, atol=5e-2, rtol=5e-2), \
        float(jnp.max(jnp.abs(q1 - ref)))

    # Exercise the multi-tile grid + partial-tile padding path.
    state2 = jax.random.normal(jax.random.PRNGKey(1), (20, state_dim),
                               jnp.float32)
    action2 = jax.random.normal(jax.random.PRNGKey(2), (20, action_dim),
                                jnp.float32)
    q2 = jax.block_until_ready(
        mlp_critic_forward(state2, action2, params, block_b=16))
    ref2 = jax.block_until_ready(reference_forward(state2, action2, params))
    assert q2.shape == (20, 1)
    assert jnp.allclose(q2, ref2, atol=5e-2, rtol=5e-2)

    print("KERNEL_OK")
</pallas_src>

<mosaic_0001>
module attributes {stable_mosaic.version = 11 : i64} {
  func.func @_critic_kernel(%arg0: i32, %arg1: memref<16x24xf32, #tpu.memory_space<vmem>>, %arg2: memref<16x8xf32, #tpu.memory_space<vmem>>, %arg3: memref<32x32xbf16, #tpu.memory_space<vmem>>, %arg4: memref<1x32xf32, #tpu.memory_space<vmem>>, %arg5: memref<32x32xbf16, #tpu.memory_space<vmem>>, %arg6: memref<1x32xf32, #tpu.memory_space<vmem>>, %arg7: memref<1x32xf32, #tpu.memory_space<vmem>>, %arg8: memref<1xf32, #tpu.memory_space<smem>>, %arg9: memref<16x1xf32, #tpu.memory_space<vmem>>) attributes {dimension_semantics = [#tpu.dimension_semantics<parallel>], iteration_bounds = array<i64: 1>, scalar_prefetch = 0 : i64, scratch_operands = 0 : i64, tpu.core_type = #tpu.core_type<tc>, window_params = [{transform_indices = @transform_0, window_bounds = array<i64: 16, 24>}, {transform_indices = @transform_1, window_bounds = array<i64: 16, 8>}, {pipeline_mode = #tpu.pipeline_mode<synchronous>, transform_indices = @transform_2, window_bounds = array<i64: 32, 32>}, {pipeline_mode = #tpu.pipeline_mode<synchronous>, transform_indices = @transform_3, window_bounds = array<i64: 1, 32>}, {pipeline_mode = #tpu.pipeline_mode<synchronous>, transform_indices = @transform_4, window_bounds = array<i64: 32, 32>}, {pipeline_mode = #tpu.pipeline_mode<synchronous>, transform_indices = @transform_5, window_bounds = array<i64: 1, 32>}, {pipeline_mode = #tpu.pipeline_mode<synchronous>, transform_indices = @transform_6, window_bounds = array<i64: 1, 32>}, {transform_indices = @transform_7, window_bounds = array<i64: 1>}, {transform_indices = @transform_8, window_bounds = array<i64: 16, 1>}]} {
    %c0 = arith.constant 0 : index
    %c0_0 = arith.constant 0 : index
    %0 = vector.load %arg1[%c0, %c0_0] : memref<16x24xf32, #tpu.memory_space<vmem>>, vector<16x24xf32>
    %c0_1 = arith.constant 0 : index
    %c0_2 = arith.constant 0 : index
    %1 = vector.load %arg2[%c0_1, %c0_2] : memref<16x8xf32, #tpu.memory_space<vmem>>, vector<16x8xf32>
    %2 = tpu.concatenate %0, %1 in 1 : vector<16x24xf32>, vector<16x8xf32> -> vector<16x32xf32>
    %3 = arith.truncf %2 : vector<16x32xf32> to vector<16x32xbf16>
    %c0_3 = arith.constant 0 : index
    %c0_4 = arith.constant 0 : index
    %4 = vector.load %arg3[%c0_3, %c0_4] : memref<32x32xbf16, #tpu.memory_space<vmem>>, vector<32x32xbf16>
    %cst = arith.constant dense<0.000000e+00> : vector<16x32xf32>
    %5 = tpu.matmul %3, %4, %cst {dimension_numbers = #tpu.dot_dimension_numbers<[1], [0], [0], [1], [0, 0, 1, 1], [], []>} : vector<16x32xbf16>, vector<32x32xbf16>, vector<16x32xf32> -> vector<16x32xf32>
    %c0_5 = arith.constant 0 : index
    %c0_6 = arith.constant 0 : index
    %6 = vector.load %arg4[%c0_5, %c0_6] : memref<1x32xf32, #tpu.memory_space<vmem>>, vector<1x32xf32>
    %7 = vector.broadcast %6 : vector<1x32xf32> to vector<16x32xf32>
    %8 = arith.addf %5, %7 : vector<16x32xf32>
    %cst_7 = arith.constant 0.000000e+00 : f32
    %9 = vector.broadcast %cst_7 : f32 to vector<16x32xf32>
    %10 = arith.maximumf %8, %9 : vector<16x32xf32>
    %11 = arith.truncf %10 : vector<16x32xf32> to vector<16x32xbf16>
    %c0_8 = arith.constant 0 : index
    %c0_9 = arith.constant 0 : index
    %12 = vector.load %arg5[%c0_8, %c0_9] : memref<32x32xbf16, #tpu.memory_space<vmem>>, vector<32x32xbf16>
    %cst_10 = arith.constant dense<0.000000e+00> : vector<16x32xf32>
    %13 = tpu.matmul %11, %12, %cst_10 {dimension_numbers = #tpu.dot_dimension_numbers<[1], [0], [0], [1], [0, 0, 1, 1], [], []>} : vector<16x32xbf16>, vector<32x32xbf16>, vector<16x32xf32> -> vector<16x32xf32>
    %c0_11 = arith.constant 0 : index
    %c0_12 = arith.constant 0 : index
    %14 = vector.load %arg6[%c0_11, %c0_12] : memref<1x32xf32, #tpu.memory_space<vmem>>, vector<1x32xf32>
    %15 = vector.broadcast %14 : vector<1x32xf32> to vector<16x32xf32>
    %16 = arith.addf %13, %15 : vector<16x32xf32>
    %cst_13 = arith.constant 0.000000e+00 : f32
    %17 = vector.broadcast %cst_13 : f32 to vector<16x32xf32>
    %18 = arith.maximumf %16, %17 : vector<16x32xf32>
    %c0_14 = arith.constant 0 : index
    %c0_15 = arith.constant 0 : index
    %19 = vector.load %arg7[%c0_14, %c0_15] : memref<1x32xf32, #tpu.memory_space<vmem>>, vector<1x32xf32>
    %20 = vector.broadcast %19 : vector<1x32xf32> to vector<16x32xf32>
    %21 = arith.mulf %18, %20 : vector<16x32xf32>
    %cst_16 = arith.constant dense<0.000000e+00> : vector<16xf32>
    %22 = vector.multi_reduction <add>, %21, %cst_16 [1] : vector<16x32xf32> to vector<16xf32>
    %23 = vector.shape_cast %22 : vector<16xf32> to vector<16x1xf32>
    %c0_17 = arith.constant 0 : index
    %24 = memref.load %arg8[%c0_17] : memref<1xf32, #tpu.memory_space<smem>>
    %25 = vector.broadcast %24 : f32 to vector<16x1xf32>
    %26 = arith.addf %23, %25 : vector<16x1xf32>
    %c0_18 = arith.constant 0 : index
    %c0_19 = arith.constant 0 : index
    %27 = vector.load %arg9[%c0_18, %c0_19] : memref<16x1xf32, #tpu.memory_space<vmem>>, vector<16x1xf32>
    tpu.vector_store %arg9[%c0_18, %c0_19], %26 {strides = array<i32>} : memref<16x1xf32, #tpu.memory_space<vmem>>, vector<16x1xf32>,
    return
  }
  func.func @transform_0(%arg0: i32) -> (i32, i32) {
    %c0_i32 = arith.constant 0 : i32
    %c0_i32_0 = arith.constant 0 : i32
    return %arg0, %c0_i32 : i32, i32
  }
  func.func @transform_1(%arg0: i32) -> (i32, i32) {
    %c0_i32 = arith.constant 0 : i32
    %c0_i32_0 = arith.constant 0 : i32
    return %arg0, %c0_i32 : i32, i32
  }
  func.func @transform_2(%arg0: i32) -> (i32, i32) {
    %c0_i32 = arith.constant 0 : i32
    %c0_i32_0 = arith.constant 0 : i32
    %c0_i32_1 = arith.constant 0 : i32
    return %c0_i32, %c0_i32_0 : i32, i32
  }
  func.func @transform_3(%arg0: i32) -> (i32, i32) {
    %c0_i32 = arith.constant 0 : i32
    %c0_i32_0 = arith.constant 0 : i32
    %c0_i32_1 = arith.constant 0 : i32
    return %c0_i32, %c0_i32_0 : i32, i32
  }
  func.func @transform_4(%arg0: i32) -> (i32, i32) {
    %c0_i32 = arith.constant 0 : i32
    %c0_i32_0 = arith.constant 0 : i32
    %c0_i32_1 = arith.constant 0 : i32
    return %c0_i32, %c0_i32_0 : i32, i32
  }
  func.func @transform_5(%arg0: i32) -> (i32, i32) {
    %c0_i32 = arith.constant 0 : i32
    %c0_i32_0 = arith.constant 0 : i32
    %c0_i32_1 = arith.constant 0 : i32
    return %c0_i32, %c0_i32_0 : i32, i32
  }
  func.func @transform_6(%arg0: i32) -> (i32, i32) {
    %c0_i32 = arith.constant 0 : i32
    %c0_i32_0 = arith.constant 0 : i32
    %c0_i32_1 = arith.constant 0 : i32
    return %c0_i32, %c0_i32_0 : i32, i32
  }
  func.func @transform_7(%arg0: i32) -> i32 {
    %c0_i32 = arith.constant 0 : i32
    %c0_i32_0 = arith.constant 0 : i32
    return %c0_i32 : i32
  }
  func.func @transform_8(%arg0: i32) -> (i32, i32) {
    %c0_i32 = arith.constant 0 : i32
    %c0_i32_0 = arith.constant 0 : i32
    return %arg0, %c0_i32 : i32, i32
  }
}

</mosaic_0001>

<bundles_post_ra>
// kernel: mlp_critic_forward.1
= control target key start
LH: loop header
LB: loop body
LE: loop exit
PB: predicated region body
PF: predicated region fallthrough
CT: control target
= control target key end

     0   :  { %s181_s11 = smov 24   ;;  %vm43_vm0 = vcmask 195584   ;;  %vm67_vm1 = vcmask 261120   ;;  %vm143_vm2 = vcmask 7168   ;;  %s273_s1 = inlined_call_operand.vmem [shape: f32[16,8], index: 1, kind: input, shape index: {}]   ;;  %s274_s2 = inlined_call_operand.vmem [shape: bf16[32,32], index: 2, kind: input, shape index: {}]   ;;  %s275_s3 = inlined_call_operand.vmem [shape: f32[1,32], index: 3, kind: input, shape index: {}]   ;;  %s276_s0 = inlined_call_operand.vmem [shape: f32[16,24], index: 0, kind: input, shape index: {}]   ;;  %s277_s5 = inlined_call_operand.vmem [shape: f32[1,32], index: 5, kind: input, shape index: {}]   ;;  %s278_s4 = inlined_call_operand.vmem [shape: bf16[32,32], index: 4, kind: input, shape index: {}]   ;;  %s279_s6 = inlined_call_operand.vmem [shape: f32[1,32], index: 6, kind: input, shape index: {}]   ;;  %s280_s7 = inlined_call_operand.<no memory space> [shape: f32[1], index: 7, kind: input, shape index: {}]   ;;  %s281_s8 = inlined_call_operand.vmem [shape: f32[16,1], index: 8, kind: output, shape index: {}]  }
   0x1   :  { %v33_v0 = vld [vmem:[%s273_s1] sm:$0xff]  ;;  %v34_v1 = vld [vmem:[%s273_s1 + $0x8] sm:$0xff]  ;;  %v140_v35 = vstv %s280_s7 }
   0x2   :  { %v169_v2 = vld [vmem:[%s274_s2 + $0x8] sm:$0xff]  ;;  %v173_v3 = vpack.i.bf16 %v34_v1, %v33_v0  ;;  %v168_v4 = vld [vmem:[%s274_s2] sm:$0xff] }
   0x3   :  { %77 = vmatpush.bf16.msra.mxu0 %v169_v2  ;;  %v31_v6 = vld [vmem:[%s276_s0] sm:$0xff]  ;;  %v32_v7 = vld [vmem:[%s276_s0 + $0x8] sm:$0xff] }
   0x4   :  { %174 = vrot.lane.b32.xlu0 %v173_v3, %s181_s11  ;;  %v171_v13 = vld [vmem:[%s278_s4 + $0x8] sm:$0xff]  ;;  %v170_v14 = vld [vmem:[%s278_s4] sm:$0xff] }
   0x5   :  { %117 = vmatpush.bf16.msra.mxu1 %v171_v13  ;;  %v178_v16 = vld [vmem:[%s275_s3] ss:$0 sm:$0xff] }
   0x6   :  { %v179_v23 = vld [vmem:[%s277_s5] ss:$0 sm:$0xff] }
   0x7   :  { %78 = vmatpush.bf16.msra.mxu0 %v168_v4  ;;  %v180_v26 = vld [vmem:[%s279_s6] ss:$0 sm:$0xff] }
   0x9   :  { %118 = vmatpush.bf16.msra.mxu1 %v170_v14 }
  0x76   :  { %v175_v5 = vpop.permute.xlu0 %174 }
  0x77   :  { %v177_v8 = vunpack.i.h.bf16 %v175_v5  ;;  %v176_v9 = vunpack.i.l.bf16 %v175_v5 }
  0x79   :  { %v44_v10 = vsel %vm43_vm0, %v31_v6, %v176_v9  ;;  %v45_v11 = vsel %vm43_vm0, %v32_v7, %v177_v8 }
  0x7a   :  { %v46_v12 = vpack.c.bf16 %v45_v11, %v44_v10 }
  0x7c   :  { %158 = vmatmul.msk.bf16.vlgmr.msra.gmra.mxu0 %vm67_vm1, %v46_v12 }
  0xf9   :  { %v80_v15 = vpop.f32.mrf.mxu0 }
  0xfa   :  { %v81_v17 = vadd.f32 %v178_v16, %v80_v15 }
  0xfc   :  { %v85_v20 = vmax.f32 %v81_v17, 0.0 }
 0x101   :  { %v82_v18 = vpop.f32.mrf.mxu0 }
 0x102   :  { %v83_v19 = vadd.f32 %v178_v16, %v82_v18 }
 0x104   :  { %v86_v21 = vmax.f32 %v83_v19, 0.0 }
 0x106   :  { %v87_v22 = vpack.c.bf16 %v86_v21, %v85_v20 }
 0x108   :  { %167 = vmatmul.msk.bf16.vlgmr.msra.gmra.mxu1 %vm67_vm1, %v87_v22 }
 0x185   :  { %v120_v24 = vpop.f32.mrf.mxu1 }
 0x186   :  { %v121_v25 = vadd.f32 %v179_v23, %v120_v24 }
 0x188   :  { %v125_v27 = vmax.f32 %v121_v25, 0.0 }
 0x18a   :  { %v131_v28 = vmul.f32 %v180_v26, %v125_v27 }
 0x18c   :  { %v133_v29 = vsel %vm67_vm1, %v131_v28, 0.0 }
 0x18d   :  { %v122_v30 = vpop.f32.mrf.mxu1  ;;  %134 = vadd.xlane.f32.xlu0 %v133_v29 }
 0x18e   :  { %v123_v31 = vadd.f32 %v179_v23, %v122_v30 }
 0x190   :  { %v126_v32 = vmax.f32 %v123_v31, 0.0 }
 0x192   :  { %v132_v33 = vmul.f32 %v180_v26, %v126_v32 }
 0x194   :  { %v136_v34 = vsel %vm67_vm1, %v132_v33, 0.0 }
 0x195   :  { %137 = vadd.xlane.f32.xlu1 %v136_v34 }
 0x200   :  { %v135_v36 = vpop.xlane.xlu0 %134 }
 0x201   :  { %v141_v37 = vadd.f32 %v140_v35, %v135_v36 }
 0x203   :  { %144 = vst.msk [vmem:[%s281_s8] sm:$0xff] %vm143_vm2, %v141_v37 }
 0x208   :  { %v138_v38 = vpop.xlane.xlu1 %137 }
 0x209   :  { %v142_v39 = vadd.f32 %v140_v35, %v138_v38 }
 0x20b   :  { %145 = vst.msk [vmem:[%s281_s8 + $0x8] sm:$0xff] %vm143_vm2, %v142_v39 }

</bundles_post_ra>
